<compile_context>
chip_gen: v7x
topology: tpu7x:2x2x1
jax: 0.10.0
libtpu: 0.0.40
codegen_flags: <defaults>
</compile_context>

<pallas_src>
import jax
import jax.numpy as jnp
from jax.experimental import pallas as pl
from jax.experimental.pallas import tpu as pltpu


def _copy_kernel(x_ref, o_ref):
    # Straight vld/vst copy of a lane-dense 2D tile.
    o_ref[...] = x_ref[...]


def _pick_row_tile(n_rows, n_cols, itemsize, target_bytes=2 * 1024 * 1024):
    """Largest row tile within ~2 MiB per buffer (<= ~8 MiB double-buffered
    in+out), rounded to a sublane-friendly multiple. Safe on v5e (16 MiB
    default scoped VMEM), v6e (32 MiB) and v7x (64 MiB physical)."""
    rows_fit = max(8, target_bytes // max(1, n_cols * itemsize))
    if rows_fit >= n_rows:
        return n_rows                      # full-height block: always legal
    if rows_fit >= 32:
        return (rows_fit // 32) * 32       # multiple of sublane pack for all dtypes
    return max(8, (rows_fit // 8) * 8)     # at least the f32 sublane pack


def squeeze_last_two(x):
    """Pallas equivalent of SqueezeLastTwo.forward: x.view(B, C)."""
    B, C = x.shape[0], x.shape[1]
    trailing = 1
    for d in x.shape[2:]:
        trailing *= d
    assert trailing == 1, "SqueezeLastTwo expects trailing dims of size 1"

    # Zero-cost metadata reshape: drop the trailing singleton dims here so the
    # kernel never sees (.., 1, 1) minor dims (which would waste vregs/VMEM).
    x2 = jnp.reshape(x, (B, C))

    itemsize = jnp.dtype(x.dtype).itemsize
    total = B * C

    # Prefer a lane-dense (rows, 128) layout => unmasked stores; otherwise fall
    # back to the natural (B, C) layout (full last dim, so still a legal block).
    if total % 128 == 0:
        rows, cols = total // 128, 128
        flat_in = jnp.reshape(x2, (rows, cols))
        reshape_back = True
    else:
        rows, cols = B, C
        flat_in = x2
        reshape_back = False

    tb = _pick_row_tile(rows, cols, itemsize)
    grid = (pl.cdiv(rows, tb),)

    out = pl.pallas_call(
        _copy_kernel,
        out_shape=jax.ShapeDtypeStruct((rows, cols), x.dtype),
        grid=grid,
        in_specs=[pl.BlockSpec((tb, cols), lambda i: (i, 0))],
        out_specs=pl.BlockSpec((tb, cols), lambda i: (i, 0)),
        compiler_params=pltpu.CompilerParams(
            dimension_semantics=("parallel",),
            vmem_limit_bytes=64 * 1024 * 1024,
        ),
        cost_estimate=pl.CostEstimate(
            flops=0,
            transcendentals=0,
            bytes_accessed=2 * total * itemsize,
        ),
    )(flat_in)

    return jnp.reshape(out, (B, C)) if reshape_back else out


if __name__ == "__main__":
    key = jax.random.PRNGKey(0)

    # Small shape consistent with the module's intended use: (B, C, 1, 1).
    B, C = 2, 4
    x = jax.random.normal(key, (B, C, 1, 1), dtype=jnp.float32)
    out = jax.block_until_ready(squeeze_last_two(x))
    ref = x.reshape(B, C)
    assert out.shape == (B, C), out.shape
    assert out.dtype == x.dtype, out.dtype
    assert jnp.array_equal(out, ref), "mismatch vs reference reshape (fallback path)"

    # Also exercise the lane-dense tiled path (B*C multiple of 128).
    B2, C2 = 8, 256
    x2 = jax.random.normal(jax.random.PRNGKey(0), (B2, C2, 1, 1), dtype=jnp.float32)
    out2 = jax.block_until_ready(squeeze_last_two(x2))
    ref2 = x2.reshape(B2, C2)
    assert out2.shape == (B2, C2), out2.shape
    assert jnp.array_equal(out2, ref2), "mismatch vs reference reshape (lane-dense path)"

    print("KERNEL_OK")
</pallas_src>

<mosaic_0001>
module attributes {stable_mosaic.version = 11 : i64} {
  func.func @_copy_kernel(%arg0: i32, %arg1: memref<2x4xf32, #tpu.memory_space<vmem>>, %arg2: memref<2x4xf32, #tpu.memory_space<vmem>>) attributes {dimension_semantics = [#tpu.dimension_semantics<parallel>], iteration_bounds = array<i64: 1>, scalar_prefetch = 0 : i64, scratch_operands = 0 : i64, tpu.core_type = #tpu.core_type<tc>, window_params = [{transform_indices = @transform_0, window_bounds = array<i64: 2, 4>}, {transform_indices = @transform_1, window_bounds = array<i64: 2, 4>}]} {
    %c0 = arith.constant 0 : index
    %c0_0 = arith.constant 0 : index
    %0 = vector.load %arg1[%c0, %c0_0] : memref<2x4xf32, #tpu.memory_space<vmem>>, vector<2x4xf32>
    %c0_1 = arith.constant 0 : index
    %c0_2 = arith.constant 0 : index
    %1 = vector.load %arg2[%c0_1, %c0_2] : memref<2x4xf32, #tpu.memory_space<vmem>>, vector<2x4xf32>
    tpu.vector_store %arg2[%c0_1, %c0_2], %0 {strides = array<i32>} : memref<2x4xf32, #tpu.memory_space<vmem>>, vector<2x4xf32>,
    return
  }
  func.func @transform_0(%arg0: i32) -> (i32, i32) {
    %c0_i32 = arith.constant 0 : i32
    %c0_i32_0 = arith.constant 0 : i32
    return %arg0, %c0_i32 : i32, i32
  }
  func.func @transform_1(%arg0: i32) -> (i32, i32) {
    %c0_i32 = arith.constant 0 : i32
    %c0_i32_0 = arith.constant 0 : i32
    return %arg0, %c0_i32 : i32, i32
  }
}

</mosaic_0001>

<bundles_post_ra>
// kernel: tpu_custom_call.1
= control target key start
LH: loop header
LB: loop body
LE: loop exit
PB: predicated region body
PF: predicated region fallthrough
CT: control target
= control target key end

     0   :  { %6 = vsyncpa [#allocation3], 0  ;;  %s125_s0 = inlined_call_operand.hbm [shape: f32[2,4], index: 0, kind: input, shape index: {}]   ;;  %s126_s1 = inlined_call_operand.hbm [shape: f32[2,4], index: 1, kind: output, shape index: {}]  }
   0x1   :  { %7 = vsyncpa [#allocation4], 0  ;;  %s89_s6 = smov [#allocation2]   ;;  %s41_s10 = scalar_lea.hbm %s125_s0, 32 }
   0x2   :  { %s14_s7 = sshll.u32 %s89_s6, 4  ;;  %p42_p0 = scmp.ne.s32.totalorder %s125_s0, %s41_s10  ;;  %s15_s7 = int_to_ptr.vmem [resolvable:$true] %s14_s7 }
   0x3   :  { %p45_p1 = scmp.lt.u32.totalorder %s41_s10, %s125_s0 }
   0x5   :  { %p47_p2 = pnand %p45_p1, %p42_p0 }
   0x7   :  { %50 = shalt.err (!%p47_p2)
}
   0x8   :  { %s51_s15 = scalar_lea.vmem %s15_s7, 32  ;;  %p56_p4 = scmp.lt.s32.totalorder %s15_s7, %s15_s7 }
   0x9   :  { %p52_p3 = scmp.ne.s32.totalorder %s15_s7, %s51_s15  ;;  %p57_p5 = scmp.lt.s32.totalorder %s51_s15, %s51_s15 }
   0xb   :  { %p58_p6 = por %p57_p5, %p56_p4 }
   0xd   :  { %p59_p7 = pnand %p58_p6, %p52_p3 }
   0xf   :  { %62 = shalt.err (!%p59_p7)
}
  0x10   :  { %17 = dma.hbm_to_vmem [thread:$0]  %s125_s0, 32, %s15_s7, [#allocation3]  }
  0x11   :  { %85 = dma.done.wait [#allocation3], 32  }
  0x12   :  { %86 = vsyncadd [#allocation3], 4294967264  ;;  %s90_s18 = smov [#allocation5]   ;;  %vm22_vm0 = vcmask 25600   ;;  %v21_v0 = vld [vmem:[#allocation2] sm:$0x3] }
  0x13   :  { %s30_s19 = sshll.u32 %s90_s18, 4  ;;  %23 = vst.msk [vmem:[#allocation5] sm:$0x3] %vm22_vm0, %v21_v0  ;;  %s31_s19 = int_to_ptr.vmem [resolvable:$true] %s30_s19 }
  0x14   :  { %s63_s20 = scalar_lea.vmem %s31_s19, 32  ;;  %p68_p9 = scmp.lt.s32.totalorder %s31_s19, %s31_s19 }
  0x15   :  { %p64_p8 = scmp.ne.s32.totalorder %s31_s19, %s63_s20  ;;  %p69_p10 = scmp.lt.s32.totalorder %s63_s20, %s63_s20 }
  0x17   :  { %p70_p11 = por %p69_p10, %p68_p9 }
  0x19   :  { %p71_p12 = pnand %p70_p11, %p64_p8 }
  0x1b   :  { %74 = shalt.err (!%p71_p12)
}
  0x1c   :  { %s75_s23 = scalar_lea.hbm %s126_s1, 32 }
  0x1d   :  { %p76_p13 = scmp.ne.s32.totalorder %s126_s1, %s75_s23  ;;  %p79_p0 = scmp.lt.u32.totalorder %s75_s23, %s126_s1 }
  0x1f   :  { %p81_p1 = pnand %p79_p0, %p76_p13 }
  0x21   :  { %84 = shalt.err (!%p81_p1)
}
  0x22   :  { %33 = dma.vmem_to_hbm [thread:$0]  %s31_s19, 32, %s126_s1, [#allocation4]  }
  0x23   :  { %87 = dma.done.wait [#allocation4], 32  }
  0x24   :  { %88 = vsyncadd [#allocation4], 4294967264 }
  0x25   :  { %37 = vsyncpa [#allocation3], 1 }
  0x26   :  { %38 = vsyncpa [#allocation4], 1 }

</bundles_post_ra>
